<compile_context>
chip_gen: v7x
topology: tpu7x:2x2x1
jax: 0.10.0
libtpu: 0.0.40
codegen_flags: <defaults>
</compile_context>

<pallas_src>
import jax
import jax.numpy as jnp
from jax.experimental import pallas as pl
from jax.experimental.pallas import tpu as pltpu

N_INPUTS = 140
N_OUTPUTS = 2
N_HIDDEN_LAYERS = 4
WIDTH = 128

OUT_PAD = 8      # 2 -> 8 f32 output lanes (full last dim of output array)
MAX_TB = 2048    # batch-tile ceiling


def _choose_tiling(batch):
    """Pick (TB, grid). TB is a multiple of 8, as large as possible
    (<= MAX_TB); grid >= 2 when the batch allows and even, so the grid
    shards evenly across v7x's two TensorCores."""
    target_grid = max(2, pl.cdiv(batch, MAX_TB))
    target_grid += target_grid % 2                 # even grid for megacore
    tb = ((pl.cdiv(batch, target_grid) + 7) // 8) * 8
    tb = max(8, min(tb, MAX_TB))
    grid = pl.cdiv(batch, tb)                      # stays even, or 1 for tiny B
    return tb, grid


def _silu(h):
    # sigmoid(h) == 0.5 * (1 + tanh(h/2)): a single EUP transcendental per
    # element (vs. exp + reciprocal = 2). h stays f32.
    return h * (0.5 * jnp.tanh(0.5 * h) + 0.5)


def mlp_kernel(x_ref, w0_ref, b0_ref, wh_ref, bh_ref, w5_ref, b5_ref, o_ref):
    # One batch tile resident in VMEM; whole MLP fused. bf16 MXU matmuls with
    # f32 accumulation; bias add + SiLU in f32.
    x = x_ref[...].astype(jnp.bfloat16)                       # (TB, 140)
    h = jnp.dot(x, w0_ref[...],
                preferred_element_type=jnp.float32) + b0_ref[...]
    h = _silu(h)
    for l in range(N_HIDDEN_LAYERS):                          # static unroll
        h = jnp.dot(h.astype(jnp.bfloat16), wh_ref[l],
                    preferred_element_type=jnp.float32) + bh_ref[l]
        h = _silu(h)
    out = jnp.dot(h.astype(jnp.bfloat16), w5_ref[...],
                  preferred_element_type=jnp.float32) + b5_ref[...]
    o_ref[...] = out.astype(o_ref.dtype)


def prepare_params(params):
    """One-time weight prep (hoisted out of the forward): bf16 matmul
    operands, f32 biases, hidden layers stacked, final layer padded to the
    OUT_PAD-lane output slab (padded columns are exact zeros)."""
    (w0, b0) = params[0]
    hidden = params[1:-1]
    (w5, b5) = params[-1]
    w0p = w0.astype(jnp.bfloat16)                                  # (140, 128)
    b0p = b0.astype(jnp.float32)                                   # (1, 128)
    whp = jnp.stack([w.astype(jnp.bfloat16) for w, _ in hidden])   # (4, 128, 128)
    bhp = jnp.stack([b.astype(jnp.float32) for _, b in hidden])    # (4, 1, 128)
    w5p = jnp.pad(w5.astype(jnp.bfloat16),
                  ((0, 0), (0, OUT_PAD - w5.shape[1])))            # (128, 8)
    b5p = jnp.pad(b5.astype(jnp.float32),
                  ((0, 0), (0, OUT_PAD - b5.shape[1])))            # (1, 8)
    return (w0p, b0p, whp, bhp, w5p, b5p)


@jax.jit
def mlp_forward(x, prepped):
    w0, b0, wh, bh, w5, b5 = prepped
    B, F = x.shape
    assert F == N_INPUTS

    TB, grid = _choose_tiling(B)
    B_pad = TB * grid
    # Only the batch remainder is padded (zero rows); no feature pad, no cast.
    xp = x if B_pad == B else jnp.pad(x, ((0, B_pad - B), (0, 0)))

    in_specs = [
        pl.BlockSpec((TB, N_INPUTS), lambda i: (i, 0)),   # x tile (last dim full)
        pl.BlockSpec(w0.shape, lambda i: (0, 0)),
        pl.BlockSpec(b0.shape, lambda i: (0, 0)),
        pl.BlockSpec(wh.shape, lambda i: (0, 0, 0)),
        pl.BlockSpec(bh.shape, lambda i: (0, 0, 0)),
        pl.BlockSpec(w5.shape, lambda i: (0, 0)),
        pl.BlockSpec(b5.shape, lambda i: (0, 0)),
    ]

    out_padded = pl.pallas_call(
        mlp_kernel,
        out_shape=jax.ShapeDtypeStruct((B_pad, OUT_PAD), jnp.float32),
        grid_spec=pltpu.PrefetchScalarGridSpec(
            num_scalar_prefetch=0,
            grid=(grid,),
            in_specs=in_specs,
            out_specs=pl.BlockSpec((TB, OUT_PAD), lambda i: (i, 0)),
        ),
        compiler_params=pltpu.CompilerParams(
            dimension_semantics=("parallel",)),
    )(xp, w0, b0, wh, bh, w5, b5)

    return out_padded[:B, :N_OUTPUTS].astype(x.dtype)


def init_params(key):
    """Deterministic parameter init. Layer l: W (in, out), b (1, out)."""
    dims = [N_INPUTS] + [WIDTH] * (N_HIDDEN_LAYERS + 1) + [N_OUTPUTS]
    params = []
    for l in range(len(dims) - 1):
        key, kw, kb = jax.random.split(key, 3)
        fan_in = dims[l]
        bound = 1.0 / jnp.sqrt(fan_in)
        w = jax.random.uniform(kw, (dims[l], dims[l + 1]), jnp.float32,
                               minval=-bound, maxval=bound)
        b = jax.random.uniform(kb, (1, dims[l + 1]), jnp.float32,
                               minval=-bound, maxval=bound)
        params.append((w, b))
    return params


def reference_forward(x, params):
    """Pure-JAX f32 reference matching the PyTorch module semantics."""
    h = x
    n = len(params)
    for l, (w, b) in enumerate(params):
        h = h @ w + b
        if l < n - 1:
            h = h * jax.nn.sigmoid(h)
    return h


if __name__ == "__main__":
    key = jax.random.PRNGKey(0)
    key, kx = jax.random.split(key)
    params = init_params(key)
    prepped = prepare_params(params)

    # Small smoke test (single tile, grid=1).
    B = 8
    x = jax.random.normal(kx, (B, N_INPUTS), jnp.float32)
    out = jax.block_until_ready(mlp_forward(x, prepped))
    ref = reference_forward(x, params)
    assert out.shape == (B, N_OUTPUTS)
    # bf16 matmul operands -> loosen tolerance vs f32 reference.
    assert jnp.allclose(out, ref, atol=5e-2, rtol=5e-2), (
        f"max abs err {jnp.max(jnp.abs(out - ref))}")

    # Larger, non-tile-multiple batch: exercises batch padding + an even,
    # multi-step grid (TB=304, grid=2) without being expensive.
    key, kx2 = jax.random.split(key)
    B2 = 600
    x2 = jax.random.normal(kx2, (B2, N_INPUTS), jnp.float32)
    out2 = jax.block_until_ready(mlp_forward(x2, prepped))
    ref2 = reference_forward(x2, params)
    assert out2.shape == (B2, N_OUTPUTS)
    assert jnp.allclose(out2, ref2, atol=5e-2, rtol=5e-2), (
        f"max abs err {jnp.max(jnp.abs(out2 - ref2))}")

    print("KERNEL_OK")
</pallas_src>

<mosaic_0001>
module attributes {stable_mosaic.version = 11 : i64} {
  func.func @mlp_kernel(%arg0: i32, %arg1: memref<8x140xf32, #tpu.memory_space<vmem>>, %arg2: memref<140x128xbf16, #tpu.memory_space<vmem>>, %arg3: memref<1x128xf32, #tpu.memory_space<vmem>>, %arg4: memref<4x128x128xbf16, #tpu.memory_space<vmem>>, %arg5: memref<4x1x128xf32, #tpu.memory_space<vmem>>, %arg6: memref<128x8xbf16, #tpu.memory_space<vmem>>, %arg7: memref<1x8xf32, #tpu.memory_space<vmem>>, %arg8: memref<8x8xf32, #tpu.memory_space<vmem>>) attributes {dimension_semantics = [#tpu.dimension_semantics<parallel>], iteration_bounds = array<i64: 1>, scalar_prefetch = 0 : i64, scratch_operands = 0 : i64, tpu.core_type = #tpu.core_type<tc>, window_params = [{transform_indices = @transform_0, window_bounds = array<i64: 8, 140>}, {pipeline_mode = #tpu.pipeline_mode<synchronous>, transform_indices = @transform_1, window_bounds = array<i64: 140, 128>}, {pipeline_mode = #tpu.pipeline_mode<synchronous>, transform_indices = @transform_2, window_bounds = array<i64: 1, 128>}, {pipeline_mode = #tpu.pipeline_mode<synchronous>, transform_indices = @transform_3, window_bounds = array<i64: 4, 128, 128>}, {pipeline_mode = #tpu.pipeline_mode<synchronous>, transform_indices = @transform_4, window_bounds = array<i64: 4, 1, 128>}, {pipeline_mode = #tpu.pipeline_mode<synchronous>, transform_indices = @transform_5, window_bounds = array<i64: 128, 8>}, {pipeline_mode = #tpu.pipeline_mode<synchronous>, transform_indices = @transform_6, window_bounds = array<i64: 1, 8>}, {transform_indices = @transform_7, window_bounds = array<i64: 8, 8>}]} {
    %c0 = arith.constant 0 : index
    %c0_0 = arith.constant 0 : index
    %0 = vector.load %arg1[%c0, %c0_0] : memref<8x140xf32, #tpu.memory_space<vmem>>, vector<8x140xf32>
    %1 = arith.truncf %0 : vector<8x140xf32> to vector<8x140xbf16>
    %c0_1 = arith.constant 0 : index
    %c0_2 = arith.constant 0 : index
    %2 = vector.load %arg2[%c0_1, %c0_2] : memref<140x128xbf16, #tpu.memory_space<vmem>>, vector<140x128xbf16>
    %cst = arith.constant dense<0.000000e+00> : vector<8x128xf32>
    %3 = tpu.matmul %1, %2, %cst {dimension_numbers = #tpu.dot_dimension_numbers<[1], [0], [0], [1], [0, 0, 1, 1], [], []>} : vector<8x140xbf16>, vector<140x128xbf16>, vector<8x128xf32> -> vector<8x128xf32>
    %c0_3 = arith.constant 0 : index
    %c0_4 = arith.constant 0 : index
    %4 = vector.load %arg3[%c0_3, %c0_4] : memref<1x128xf32, #tpu.memory_space<vmem>>, vector<1x128xf32>
    %5 = vector.broadcast %4 : vector<1x128xf32> to vector<8x128xf32>
    %6 = arith.addf %3, %5 : vector<8x128xf32>
    %cst_5 = arith.constant 5.000000e-01 : f32
    %7 = vector.broadcast %cst_5 : f32 to vector<8x128xf32>
    %8 = arith.mulf %7, %6 : vector<8x128xf32>
    %9 = math.tanh %8 : vector<8x128xf32>
    %cst_6 = arith.constant 5.000000e-01 : f32
    %10 = vector.broadcast %cst_6 : f32 to vector<8x128xf32>
    %11 = arith.mulf %10, %9 : vector<8x128xf32>
    %cst_7 = arith.constant 5.000000e-01 : f32
    %12 = vector.broadcast %cst_7 : f32 to vector<8x128xf32>
    %13 = arith.addf %11, %12 : vector<8x128xf32>
    %14 = arith.mulf %6, %13 : vector<8x128xf32>
    %15 = arith.truncf %14 : vector<8x128xf32> to vector<8x128xbf16>
    %c0_8 = arith.constant 0 : index
    %c0_9 = arith.constant 0 : index
    %c0_10 = arith.constant 0 : index
    %16 = vector.load %arg4[%c0_8, %c0_9, %c0_10] : memref<4x128x128xbf16, #tpu.memory_space<vmem>>, vector<1x128x128xbf16>
    %17 = vector.shape_cast %16 : vector<1x128x128xbf16> to vector<128x128xbf16>
    %cst_11 = arith.constant dense<0.000000e+00> : vector<8x128xf32>
    %18 = tpu.matmul %15, %17, %cst_11 {dimension_numbers = #tpu.dot_dimension_numbers<[1], [0], [0], [1], [0, 0, 1, 1], [], []>} : vector<8x128xbf16>, vector<128x128xbf16>, vector<8x128xf32> -> vector<8x128xf32>
    %c0_12 = arith.constant 0 : index
    %c0_13 = arith.constant 0 : index
    %c0_14 = arith.constant 0 : index
    %19 = vector.load %arg5[%c0_12, %c0_13, %c0_14] : memref<4x1x128xf32, #tpu.memory_space<vmem>>, vector<1x1x128xf32>
    %20 = vector.shape_cast %19 : vector<1x1x128xf32> to vector<1x128xf32>
    %21 = vector.broadcast %20 : vector<1x128xf32> to vector<8x128xf32>
    %22 = arith.addf %18, %21 : vector<8x128xf32>
    %cst_15 = arith.constant 5.000000e-01 : f32
    %23 = vector.broadcast %cst_15 : f32 to vector<8x128xf32>
    %24 = arith.mulf %23, %22 : vector<8x128xf32>
    %25 = math.tanh %24 : vector<8x128xf32>
    %cst_16 = arith.constant 5.000000e-01 : f32
    %26 = vector.broadcast %cst_16 : f32 to vector<8x128xf32>
    %27 = arith.mulf %26, %25 : vector<8x128xf32>
    %cst_17 = arith.constant 5.000000e-01 : f32
    %28 = vector.broadcast %cst_17 : f32 to vector<8x128xf32>
    %29 = arith.addf %27, %28 : vector<8x128xf32>
    %30 = arith.mulf %22, %29 : vector<8x128xf32>
    %31 = arith.truncf %30 : vector<8x128xf32> to vector<8x128xbf16>
    %c1 = arith.constant 1 : index
    %c0_18 = arith.constant 0 : index
    %c0_19 = arith.constant 0 : index
    %32 = vector.load %arg4[%c1, %c0_18, %c0_19] : memref<4x128x128xbf16, #tpu.memory_space<vmem>>, vector<1x128x128xbf16>
    %33 = vector.shape_cast %32 : vector<1x128x128xbf16> to vector<128x128xbf16>
    %cst_20 = arith.constant dense<0.000000e+00> : vector<8x128xf32>
    %34 = tpu.matmul %31, %33, %cst_20 {dimension_numbers = #tpu.dot_dimension_numbers<[1], [0], [0], [1], [0, 0, 1, 1], [], []>} : vector<8x128xbf16>, vector<128x128xbf16>, vector<8x128xf32> -> vector<8x128xf32>
    %c1_21 = arith.constant 1 : index
    %c0_22 = arith.constant 0 : index
    %c0_23 = arith.constant 0 : index
    %35 = vector.load %arg5[%c1_21, %c0_22, %c0_23] : memref<4x1x128xf32, #tpu.memory_space<vmem>>, vector<1x1x128xf32>
    %36 = vector.shape_cast %35 : vector<1x1x128xf32> to vector<1x128xf32>
    %37 = vector.broadcast %36 : vector<1x128xf32> to vector<8x128xf32>
    %38 = arith.addf %34, %37 : vector<8x128xf32>
    %cst_24 = arith.constant 5.000000e-01 : f32
    %39 = vector.broadcast %cst_24 : f32 to vector<8x128xf32>
    %40 = arith.mulf %39, %38 : vector<8x128xf32>
    %41 = math.tanh %40 : vector<8x128xf32>
    %cst_25 = arith.constant 5.000000e-01 : f32
    %42 = vector.broadcast %cst_25 : f32 to vector<8x128xf32>
    %43 = arith.mulf %42, %41 : vector<8x128xf32>
    %cst_26 = arith.constant 5.000000e-01 : f32
    %44 = vector.broadcast %cst_26 : f32 to vector<8x128xf32>
    %45 = arith.addf %43, %44 : vector<8x128xf32>
    %46 = arith.mulf %38, %45 : vector<8x128xf32>
    %47 = arith.truncf %46 : vector<8x128xf32> to vector<8x128xbf16>
    %c2 = arith.constant 2 : index
    %c0_27 = arith.constant 0 : index
    %c0_28 = arith.constant 0 : index
    %48 = vector.load %arg4[%c2, %c0_27, %c0_28] : memref<4x128x128xbf16, #tpu.memory_space<vmem>>, vector<1x128x128xbf16>
    %49 = vector.shape_cast %48 : vector<1x128x128xbf16> to vector<128x128xbf16>
    %cst_29 = arith.constant dense<0.000000e+00> : vector<8x128xf32>
    %50 = tpu.matmul %47, %49, %cst_29 {dimension_numbers = #tpu.dot_dimension_numbers<[1], [0], [0], [1], [0, 0, 1, 1], [], []>} : vector<8x128xbf16>, vector<128x128xbf16>, vector<8x128xf32> -> vector<8x128xf32>
    %c2_30 = arith.constant 2 : index
    %c0_31 = arith.constant 0 : index
    %c0_32 = arith.constant 0 : index
    %51 = vector.load %arg5[%c2_30, %c0_31, %c0_32] : memref<4x1x128xf32, #tpu.memory_space<vmem>>, vector<1x1x128xf32>
    %52 = vector.shape_cast %51 : vector<1x1x128xf32> to vector<1x128xf32>
    %53 = vector.broadcast %52 : vector<1x128xf32> to vector<8x128xf32>
    %54 = arith.addf %50, %53 : vector<8x128xf32>
    %cst_33 = arith.constant 5.000000e-01 : f32
    %55 = vector.broadcast %cst_33 : f32 to vector<8x128xf32>
    %56 = arith.mulf %55, %54 : vector<8x128xf32>
    %57 = math.tanh %56 : vector<8x128xf32>
    %cst_34 = arith.constant 5.000000e-01 : f32
    %58 = vector.broadcast %cst_34 : f32 to vector<8x128xf32>
    %59 = arith.mulf %58, %57 : vector<8x128xf32>
    %cst_35 = arith.constant 5.000000e-01 : f32
    %60 = vector.broadcast %cst_35 : f32 to vector<8x128xf32>
    %61 = arith.addf %59, %60 : vector<8x128xf32>
    %62 = arith.mulf %54, %61 : vector<8x128xf32>
    %63 = arith.truncf %62 : vector<8x128xf32> to vector<8x128xbf16>
    %c3 = arith.constant 3 : index
    %c0_36 = arith.constant 0 : index
    %c0_37 = arith.constant 0 : index
    %64 = vector.load %arg4[%c3, %c0_36, %c0_37] : memref<4x128x128xbf16, #tpu.memory_space<vmem>>, vector<1x128x128xbf16>
    %65 = vector.shape_cast %64 : vector<1x128x128xbf16> to vector<128x128xbf16>
    %cst_38 = arith.constant dense<0.000000e+00> : vector<8x128xf32>
    %66 = tpu.matmul %63, %65, %cst_38 {dimension_numbers = #tpu.dot_dimension_numbers<[1], [0], [0], [1], [0, 0, 1, 1], [], []>} : vector<8x128xbf16>, vector<128x128xbf16>, vector<8x128xf32> -> vector<8x128xf32>
    %c3_39 = arith.constant 3 : index
    %c0_40 = arith.constant 0 : index
    %c0_41 = arith.constant 0 : index
    %67 = vector.load %arg5[%c3_39, %c0_40, %c0_41] : memref<4x1x128xf32, #tpu.memory_space<vmem>>, vector<1x1x128xf32>
    %68 = vector.shape_cast %67 : vector<1x1x128xf32> to vector<1x128xf32>
    %69 = vector.broadcast %68 : vector<1x128xf32> to vector<8x128xf32>
    %70 = arith.addf %66, %69 : vector<8x128xf32>
    %cst_42 = arith.constant 5.000000e-01 : f32
    %71 = vector.broadcast %cst_42 : f32 to vector<8x128xf32>
    %72 = arith.mulf %71, %70 : vector<8x128xf32>
    %73 = math.tanh %72 : vector<8x128xf32>
    %cst_43 = arith.constant 5.000000e-01 : f32
    %74 = vector.broadcast %cst_43 : f32 to vector<8x128xf32>
    %75 = arith.mulf %74, %73 : vector<8x128xf32>
    %cst_44 = arith.constant 5.000000e-01 : f32
    %76 = vector.broadcast %cst_44 : f32 to vector<8x128xf32>
    %77 = arith.addf %75, %76 : vector<8x128xf32>
    %78 = arith.mulf %70, %77 : vector<8x128xf32>
    %79 = arith.truncf %78 : vector<8x128xf32> to vector<8x128xbf16>
    %c0_45 = arith.constant 0 : index
    %c0_46 = arith.constant 0 : index
    %80 = vector.load %arg6[%c0_45, %c0_46] : memref<128x8xbf16, #tpu.memory_space<vmem>>, vector<128x8xbf16>
    %cst_47 = arith.constant dense<0.000000e+00> : vector<8x8xf32>
    %81 = tpu.matmul %79, %80, %cst_47 {dimension_numbers = #tpu.dot_dimension_numbers<[1], [0], [0], [1], [0, 0, 1, 1], [], []>} : vector<8x128xbf16>, vector<128x8xbf16>, vector<8x8xf32> -> vector<8x8xf32>
    %c0_48 = arith.constant 0 : index
    %c0_49 = arith.constant 0 : index
    %82 = vector.load %arg7[%c0_48, %c0_49] : memref<1x8xf32, #tpu.memory_space<vmem>>, vector<1x8xf32>
    %83 = vector.broadcast %82 : vector<1x8xf32> to vector<8x8xf32>
    %84 = arith.addf %81, %83 : vector<8x8xf32>
    %c0_50 = arith.constant 0 : index
    %c0_51 = arith.constant 0 : index
    %85 = vector.load %arg8[%c0_50, %c0_51] : memref<8x8xf32, #tpu.memory_space<vmem>>, vector<8x8xf32>
    tpu.vector_store %arg8[%c0_50, %c0_51], %84 {strides = array<i32>} : memref<8x8xf32, #tpu.memory_space<vmem>>, vector<8x8xf32>,
    return
  }
  func.func @transform_0(%arg0: i32) -> (i32, i32) {
    %c0_i32 = arith.constant 0 : i32
    %c0_i32_0 = arith.constant 0 : i32
    return %arg0, %c0_i32 : i32, i32
  }
  func.func @transform_1(%arg0: i32) -> (i32, i32) {
    %c0_i32 = arith.constant 0 : i32
    %c0_i32_0 = arith.constant 0 : i32
    %c0_i32_1 = arith.constant 0 : i32
    return %c0_i32, %c0_i32_0 : i32, i32
  }
  func.func @transform_2(%arg0: i32) -> (i32, i32) {
    %c0_i32 = arith.constant 0 : i32
    %c0_i32_0 = arith.constant 0 : i32
    %c0_i32_1 = arith.constant 0 : i32
    return %c0_i32, %c0_i32_0 : i32, i32
  }
  func.func @transform_3(%arg0: i32) -> (i32, i32, i32) {
    %c0_i32 = arith.constant 0 : i32
    %c0_i32_0 = arith.constant 0 : i32
    %c0_i32_1 = arith.constant 0 : i32
    %c0_i32_2 = arith.constant 0 : i32
    return %c0_i32, %c0_i32_0, %c0_i32_1 : i32, i32, i32
  }
  func.func @transform_4(%arg0: i32) -> (i32, i32, i32) {
    %c0_i32 = arith.constant 0 : i32
    %c0_i32_0 = arith.constant 0 : i32
    %c0_i32_1 = arith.constant 0 : i32
    %c0_i32_2 = arith.constant 0 : i32
    return %c0_i32, %c0_i32_0, %c0_i32_1 : i32, i32, i32
  }
  func.func @transform_5(%arg0: i32) -> (i32, i32) {
    %c0_i32 = arith.constant 0 : i32
    %c0_i32_0 = arith.constant 0 : i32
    %c0_i32_1 = arith.constant 0 : i32
    return %c0_i32, %c0_i32_0 : i32, i32
  }
  func.func @transform_6(%arg0: i32) -> (i32, i32) {
    %c0_i32 = arith.constant 0 : i32
    %c0_i32_0 = arith.constant 0 : i32
    %c0_i32_1 = arith.constant 0 : i32
    return %c0_i32, %c0_i32_0 : i32, i32
  }
  func.func @transform_7(%arg0: i32) -> (i32, i32) {
    %c0_i32 = arith.constant 0 : i32
    %c0_i32_0 = arith.constant 0 : i32
    return %arg0, %c0_i32 : i32, i32
  }
}

</mosaic_0001>

<bundles_post_ra>
// kernel: mlp_forward.1
= control target key start
LH: loop header
LB: loop body
LE: loop exit
PB: predicated region body
PF: predicated region fallthrough
CT: control target
= control target key end

     0   :  { %12 = vsyncpa [#allocation3], 0  ;;  %s1274_s0 = inlined_call_operand.vmem [shape: f32[8,140], index: 0, kind: input, shape index: {}]   ;;  %s1275_s1 = inlined_call_operand.hbm [shape: bf16[140,128], index: 1, kind: input, shape index: {}]   ;;  %s1276_s2 = inlined_call_operand.vmem [shape: f32[1,128], index: 2, kind: input, shape index: {}]   ;;  %s1277_s3 = inlined_call_operand.hbm [shape: bf16[4,128,128], index: 3, kind: input, shape index: {}]   ;;  %s1278_s4 = inlined_call_operand.vmem [shape: f32[4,1,128], index: 4, kind: input, shape index: {}]   ;;  %s1279_s5 = inlined_call_operand.vmem [shape: bf16[128,8], index: 5, kind: input, shape index: {}]   ;;  %s1280_s6 = inlined_call_operand.vmem [shape: f32[1,8], index: 6, kind: input, shape index: {}]   ;;  %s1281_s7 = inlined_call_operand.vmem [shape: f32[8,8], index: 7, kind: output, shape index: {}]  }
   0x1   :  { %13 = vsyncpa [#allocation5], 0  ;;  %s1102_s24 = smov [#allocation2]   ;;  %s1054_s28 = scalar_lea.hbm %s1275_s1, 1152 }
   0x2   :  { %s21_s25 = sshll.u32 %s1102_s24, 4  ;;  %p1055_p0 = scmp.ne.s32.totalorder %s1275_s1, %s1054_s28  ;;  %s22_s25 = int_to_ptr.vmem [resolvable:$true] %s21_s25 }
   0x3   :  { %p1058_p1 = scmp.lt.u32.totalorder %s1054_s28, %s1275_s1 }
   0x5   :  { %p1060_p2 = pnand %p1058_p1, %p1055_p0 }
   0x7   :  { %1063 = shalt.err (!%p1060_p2)
}
   0x8   :  { %s1064_s10 = scalar_lea.vmem %s22_s25, 1152  ;;  %p1069_p4 = scmp.lt.s32.totalorder %s22_s25, %s22_s25 }
   0x9   :  { %p1065_p3 = scmp.ne.s32.totalorder %s22_s25, %s1064_s10  ;;  %p1070_p5 = scmp.lt.s32.totalorder %s1064_s10, %s1064_s10 }
   0xb   :  { %p1071_p6 = por %p1070_p5, %p1069_p4 }
   0xd   :  { %p1072_p7 = pnand %p1071_p6, %p1065_p3 }
   0xf   :  { %1075 = shalt.err (!%p1072_p7)
}
  0x10   :  { %s1103_s11 = smov 64   ;;  %s1104_s12 = smov 4  }
  0x11   :  { %27 = dma.hbm_to_vmem [thread:$0]  %s1275_s1, 1152, %s22_s25, [#allocation3], %s1103_s11, %s1103_s11, %s1104_s12  }
  0x12   :  { %s1105_s15 = smov [#allocation4]   ;;  %s1076_s19 = scalar_lea.hbm %s1277_s3, 4096 }
  0x13   :  { %s35_s16 = sshll.u32 %s1105_s15, 4  ;;  %p1077_p8 = scmp.ne.s32.totalorder %s1277_s3, %s1076_s19  ;;  %s36_s16 = int_to_ptr.vmem [resolvable:$true] %s35_s16 }
  0x14   :  { %p1080_p9 = scmp.lt.u32.totalorder %s1076_s19, %s1277_s3 }
  0x16   :  { %p1082_p10 = pnand %p1080_p9, %p1077_p8 }
  0x18   :  { %1085 = shalt.err (!%p1082_p10)
}
  0x19   :  { %s1086_s24 = scalar_lea.vmem %s36_s16, 4096  ;;  %p1091_p12 = scmp.lt.s32.totalorder %s36_s16, %s36_s16 }
  0x1a   :  { %p1087_p11 = scmp.ne.s32.totalorder %s36_s16, %s1086_s24  ;;  %p1092_p13 = scmp.lt.s32.totalorder %s1086_s24, %s1086_s24 }
  0x1c   :  { %p1093_p0 = por %p1092_p13, %p1091_p12 }
  0x1e   :  { %p1094_p1 = pnand %p1093_p0, %p1087_p11 }
  0x20   :  { %1097 = shalt.err (!%p1094_p1)
}
  0x21   :  { %41 = dma.hbm_to_vmem [thread:$0]  %s1277_s3, 4096, %s36_s16, [#allocation5], %s1103_s11, %s1103_s11, %s1104_s12  }
  0x22   :  { %1098 = dma.done.wait [#allocation3], 1152  }
  0x23   :  { %1099 = vsyncadd [#allocation3], 4294966144 }
  0x24   :  { %1100 = dma.done.wait [#allocation5], 4096  }
  0x25   :  { %1101 = vsyncadd [#allocation5], 4294963200  ;;  %v1106_v0 = vmov 0   ;;  %v1107_v1 = vmov 0.0   ;;  %v995_v2 = vld [vmem:[#allocation2] sm:$0xff]   ;;  %v996_v3 = vld [vmem:[#allocation2 + $0x8] sm:$0xff]  }
  0x26   :  { %145 = vmatprep.subr.bf16.mxu0 %v1106_v0  ;;  %888 = vmatprep.subr.bf16.mxu1 %v1107_v1  ;;  %v997_v4 = vld [vmem:[#allocation2 + $0x10] sm:$0xff]   ;;  %vm141_vm0 = vcmask 1045504   ;;  %v1003_v5 = vld [vmem:[#allocation2 + $0x40] sm:$0x3f]   ;;  %v998_v6 = vld [vmem:[#allocation2 + $0x18] sm:$0xff]   ;;  %vm137_vm1 = vcmask 97280  }
  0x27   :  { %146 = vmatpush1.bf16.msra.mxu0 %v995_v2  ;;  %v56_v7 = vld [vmem:[%s1274_s0 + $0x8] sm:$0xff]  ;;  %v143_v10 = vsel %vm141_vm0, %v1003_v5, 0  ;;  %v1005_v11 = vld [vmem:[#allocation4 + $0x8] sm:$0xff]   ;;  %v999_v12 = vld [vmem:[#allocation2 + $0x20] sm:$0xff]   ;;  %vm1108_vm2 = vmmov 0   ;;  %vm776_vm3 = vcmask 64512  }
  0x28   :  { %147 = vmatprep.subr.bf16.mxu0 %v1106_v0  ;;  %v58_v8 = vpack.c.bf16 %v56_v7, %v56_v7  ;;  %v1004_v9 = vld [vmem:[#allocation4] sm:$0xff]   ;;  %v1001_v14 = vld [vmem:[#allocation2 + $0x30] sm:$0xff]   ;;  %v1002_v15 = vld [vmem:[#allocation2 + $0x38] sm:$0xff]   ;;  %904 = vmatprep.mubr.msk.bf16.mxu1 %vm1108_vm2, %v1107_v1 }
  0x29   :  { %889 = vmatpush3.bf16.msra.mxu1 %v1004_v9  ;;  %v1000_v13 = vld [vmem:[#allocation2 + $0x28] sm:$0xff]   ;;  %v55_v16 = vld [vmem:[%s1274_s0] sm:$0xff]  ;;  %v1006_v18 = vld [vmem:[#allocation4 + $0x10] sm:$0xff]  }
  0x2a   :  { %794 = vmatprep.mubr.msk.bf16.mxu0 %vm137_vm1, %v58_v8  ;;  %890 = vmatprep.subr.bf16.mxu1 %v1107_v1  ;;  %v57_v17 = vpack.c.bf16 %v55_v16, %v55_v16  ;;  %v1007_v19 = vld [vmem:[#allocation4 + $0x18] sm:$0xff]   ;;  %v1008_v20 = vld [vmem:[#allocation4 + $0x20] sm:$0xff]   ;;  %v1009_v21 = vld [vmem:[#allocation4 + $0x28] sm:$0xff]  }
  0x2b   :  { %148 = vmatpush1.bf16.msra.mxu0 %v996_v3  ;;  %v1010_v22 = vld [vmem:[#allocation4 + $0x30] sm:$0xff]   ;;  %v1011_v23 = vld [vmem:[#allocation4 + $0x38] sm:$0xff]   ;;  %v1012_v35 = vld [vmem:[#allocation4 + $0x40] sm:$0xff]  }
  0x2c   :  { %149 = vmatprep.subr.bf16.mxu0 %v1106_v0  ;;  %v784_v24 = vld [vmem:[%s1276_s2] ss:$0 sm:$0xff]  ;;  %v1013_v37 = vld [vmem:[#allocation4 + $0x48] sm:$0xff]   ;;  %v1014_v38 = vld [vmem:[#allocation4 + $0x50] sm:$0xff]  }
  0x2d   :  { %891 = vmatpush3.bf16.msra.mxu1 %v1005_v11  ;;  %v1015_v39 = vld [vmem:[#allocation4 + $0x58] sm:$0xff]   ;;  %v1016_v40 = vld [vmem:[#allocation4 + $0x60] sm:$0xff]   ;;  %v1017_v41 = vld [vmem:[#allocation4 + $0x68] sm:$0xff]  }
  0x2e   :  { %892 = vmatprep.subr.bf16.mxu1 %v1107_v1  ;;  %v1018_v42 = vld [vmem:[#allocation4 + $0x70] sm:$0xff]   ;;  %v1019_v43 = vld [vmem:[#allocation4 + $0x78] sm:$0xff]   ;;  %v1020_v44 = vld [vmem:[#allocation4 + $0x80] sm:$0xff]  }
  0x2f   :  { %150 = vmatpush1.bf16.msra.mxu0 %v997_v4  ;;  %v1021_v45 = vld [vmem:[#allocation4 + $0x88] sm:$0xff]   ;;  %v795_v46 = vld [vmem:[%s1278_s4] ss:$0 sm:$0xff]  ;;  %v1022_v58 = vld [vmem:[#allocation4 + $0x90] sm:$0xff]  }
  0x30   :  { %151 = vmatprep.subr.bf16.mxu0 %v1106_v0  ;;  %v1023_v59 = vld [vmem:[#allocation4 + $0x98] sm:$0xff]   ;;  %v1024_v60 = vld [vmem:[#allocation4 + $0xa0] sm:$0xff]   ;;  %v1025_v61 = vld [vmem:[#allocation4 + $0xa8] sm:$0xff]  }
  0x31   :  { %893 = vmatpush3.bf16.msra.mxu1 %v1006_v18  ;;  %v1026_v62 = vld [vmem:[#allocation4 + $0xb0] sm:$0xff]   ;;  %v1027_v63 = vld [vmem:[#allocation4 + $0xb8] sm:$0xff]   ;;  %v1029_v2 = vld [vmem:[#allocation4 + $0xc8] sm:$0xff]  }
  0x32   :  { %894 = vmatprep.subr.bf16.mxu1 %v1107_v1  ;;  %v805_v3 = vld [vmem:[%s1278_s4 + $0x1] ss:$0 sm:$0xff]  ;;  %v1033_v18 = vld [vmem:[#allocation4 + $0xe8] sm:$0xff]  }
  0x33   :  { %152 = vmatpush1.bf16.msra.mxu0 %v998_v6  ;;  %v1031_v16 = vld [vmem:[#allocation4 + $0xd8] sm:$0xff]  }
  0x34   :  { %153 = vmatprep.subr.bf16.mxu0 %v1106_v0 }
  0x35   :  { %895 = vmatpush3.bf16.msra.mxu1 %v1007_v19  ;;  %v1034_v19 = vld [vmem:[#allocation4 + $0xf0] sm:$0xff]  }
  0x36   :  { %896 = vmatprep.subr.bf16.mxu1 %v1107_v1 }
  0x37   :  { %154 = vmatpush1.bf16.msra.mxu0 %v999_v12 }
  0x38   :  { %155 = vmatprep.subr.bf16.mxu0 %v1106_v0 }
  0x39   :  { %897 = vmatpush3.bf16.msra.mxu1 %v1008_v20  ;;  %v1035_v20 = vld [vmem:[#allocation4 + $0xf8] sm:$0xff]  }
  0x3a   :  { %898 = vmatprep.subr.bf16.mxu1 %v1107_v1 }
  0x3b   :  { %156 = vmatpush1.bf16.msra.mxu0 %v1000_v13 }
  0x3c   :  { %157 = vmatprep.subr.bf16.mxu0 %v1106_v0 }
  0x3d   :  { %899 = vmatpush3.bf16.msra.mxu1 %v1009_v21  ;;  %v1036_v21 = vld [vmem:[%s1279_s5] sm:$0xff]  }
  0x3e   :  { %900 = vmatprep.subr.bf16.mxu1 %v1107_v1 }
  0x3f   :  { %158 = vmatpush1.bf16.msra.mxu0 %v1001_v14 }
  0x40   :  { %159 = vmatprep.subr.bf16.mxu0 %v1106_v0 }
  0x41   :  { %901 = vmatpush3.bf16.msra.mxu1 %v1010_v22  ;;  %v1037_v22 = vld [vmem:[%s1279_s5 + $0x8] sm:$0xff]  }
  0x42   :  { %902 = vmatprep.subr.bf16.mxu1 %v1107_v1 }
  0x43   :  { %160 = vmatpush1.bf16.msra.mxu0 %v1002_v15  ;;  %v1030_v15 = vld [vmem:[#allocation4 + $0xd0] sm:$0xff]  }
  0x44   :  { %161 = vmatprep.subr.bf16.mxu0 %v1106_v0  ;;  %v1028_v0 = vld [vmem:[#allocation4 + $0xc0] sm:$0xff]  }
  0x45   :  { %903 = vmatpush3.bf16.msra.mxu1 %v1011_v23  ;;  %v815_v23 = vld [vmem:[%s1278_s4 + $0x2] ss:$0 sm:$0xff] }
  0x46   :  { %908 = vmatprep.subr.bf16.mxu1 %v1107_v1 }
  0x47   :  { %162 = vmatpush1.bf16.msra.mxu0 %v143_v10 }
  0x48   :  { %928 = vmatprep.subr.bf16.mxu0 %v1107_v1 }
  0x4a   :  { %178 = vmatmul.mubr.bf16.vlgmr.msra.gmra.mrb[0].mxu0 %v57_v17  ;;  %v1032_v17 = vld [vmem:[#allocation4 + $0xe0] sm:$0xff]  }
  0x4b   :  { %944 = vmatprep.mubr.msk.bf16.mxu0 %vm1108_vm2, %v1107_v1  ;;  %929 = vmatpush3.bf16.msra.mxu0 %v1020_v44 }
  0x4c   :  { %930 = vmatprep.subr.bf16.mxu0 %v1107_v1 }
  0x4f   :  { %931 = vmatpush3.bf16.msra.mxu0 %v1021_v45 }
  0x50   :  { %932 = vmatprep.subr.bf16.mxu0 %v1107_v1 }
  0x53   :  { %933 = vmatpush3.bf16.msra.mxu0 %v1022_v58 }
  0x54   :  { %934 = vmatprep.subr.bf16.mxu0 %v1107_v1 }
  0x57   :  { %935 = vmatpush3.bf16.msra.mxu0 %v1023_v59 }
  0x58   :  { %936 = vmatprep.subr.bf16.mxu0 %v1107_v1 }
  0x5b   :  { %937 = vmatpush3.bf16.msra.mxu0 %v1024_v60 }
  0x5c   :  { %938 = vmatprep.subr.bf16.mxu0 %v1107_v1 }
  0x5f   :  { %939 = vmatpush3.bf16.msra.mxu0 %v1025_v61 }
  0x60   :  { %940 = vmatprep.subr.bf16.mxu0 %v1107_v1 }
  0x63   :  { %941 = vmatpush3.bf16.msra.mxu0 %v1026_v62 }
  0x64   :  { %942 = vmatprep.subr.bf16.mxu0 %v1107_v1 }
  0x67   :  { %943 = vmatpush3.bf16.msra.mxu0 %v1027_v63 }
  0x68   :  { %968 = vmatprep.subr.bf16.mxu0 %v1107_v1 }
 0x11d   :  { %v179_v25 = vpop.f32.mrb[0].mxu0 }
 0x11e   :  { %v180_v26 = vadd.f32 %v784_v24, %v179_v25  ;;  %v181_v27 = vpop.f32.mrb[1].mxu0 }
 0x11f   :  { %v182_v28 = vpop.f32.mrb[2].mxu0 }
 0x120   :  { %v185_v29 = vmul.f32 0.5, %v180_v26  ;;  %v183_v30 = vpop.f32.mrb[3].mxu0 }
 0x122   :  { %1044 = vtanh.f32 %v185_v29 }
 0x12c   :  { %v1045_v31 = vpop.eup %1044 }
 0x12d   :  { %v187_v32 = vmul.f32 0.5, %v1045_v31 }
 0x12f   :  { %v188_v33 = vadd.f32 0.5, %v187_v32 }
 0x131   :  { %v189_v34 = vmul.f32 %v188_v33, %v180_v26 }
 0x133   :  { %v190_v36 = vpack.c.bf16 %v189_v34, %v189_v34 }
 0x135   :  { %905 = vmatmul.mubr.bf16.vlgmr.msra.gmra.mrb[0].mxu1 %v190_v36  ;;  %v1039_v36 = vld [vmem:[%s1279_s5 + $0x18] sm:$0xff]  }
 0x136   :  { %909 = vmatpush3.bf16.msra.mxu1 %v1012_v35  ;;  %924 = vmatprep.mubr.msk.bf16.mxu1 %vm1108_vm2, %v1107_v1  ;;  %v1038_v35 = vld [vmem:[%s1279_s5 + $0x10] sm:$0xff]  }
 0x137   :  { %910 = vmatprep.subr.bf16.mxu1 %v1107_v1 }
 0x13a   :  { %911 = vmatpush3.bf16.msra.mxu1 %v1013_v37  ;;  %v1040_v37 = vld [vmem:[%s1279_s5 + $0x20] sm:$0xff]  }
 0x13b   :  { %912 = vmatprep.subr.bf16.mxu1 %v1107_v1 }
 0x13e   :  { %913 = vmatpush3.bf16.msra.mxu1 %v1014_v38  ;;  %v1041_v38 = vld [vmem:[%s1279_s5 + $0x28] sm:$0xff]  }
 0x13f   :  { %914 = vmatprep.subr.bf16.mxu1 %v1107_v1 }
 0x142   :  { %915 = vmatpush3.bf16.msra.mxu1 %v1015_v39  ;;  %v1042_v39 = vld [vmem:[%s1279_s5 + $0x30] sm:$0xff]  }
 0x143   :  { %916 = vmatprep.subr.bf16.mxu1 %v1107_v1 }
 0x146   :  { %917 = vmatpush3.bf16.msra.mxu1 %v1016_v40  ;;  %v1043_v40 = vld [vmem:[%s1279_s5 + $0x38] sm:$0xff]  }
 0x147   :  { %918 = vmatprep.subr.bf16.mxu1 %v1107_v1 }
 0x14a   :  { %919 = vmatpush3.bf16.msra.mxu1 %v1017_v41  ;;  %v825_v41 = vld [vmem:[%s1278_s4 + $0x3] ss:$0 sm:$0xff] }
 0x14b   :  { %920 = vmatprep.subr.bf16.mxu1 %v1107_v1 }
 0x14e   :  { %921 = vmatpush3.bf16.msra.mxu1 %v1018_v42 }
 0x14f   :  { %922 = vmatprep.subr.bf16.mxu1 %v1107_v1 }
 0x152   :  { %923 = vmatpush3.bf16.msra.mxu1 %v1019_v43 }
 0x153   :  { %948 = vmatprep.subr.bf16.mxu1 %v1107_v1 }
 0x208   :  { %v296_v47 = vpop.f32.mrb[0].mxu1 }
 0x209   :  { %v297_v48 = vadd.f32 %v795_v46, %v296_v47  ;;  %v906_v49 = vpop.f32.mrb[1].mxu1 }
 0x20a   :  { %v299_v50 = vpop.f32.mrb[2].mxu1 }
 0x20b   :  { %v302_v51 = vmul.f32 0.5, %v297_v48  ;;  %v907_v52 = vpop.f32.mrb[3].mxu1 }
 0x20c   :  { %v834_v52 = vld [vmem:[%s1280_s6] ss:$0 sm:$0xff] }
 0x20d   :  { %1046 = vtanh.f32 %v302_v51 }
 0x217   :  { %v1047_v53 = vpop.eup %1046 }
 0x218   :  { %v304_v54 = vmul.f32 0.5, %v1047_v53 }
 0x21a   :  { %v305_v55 = vadd.f32 0.5, %v304_v54 }
 0x21c   :  { %v306_v56 = vmul.f32 %v305_v55, %v297_v48 }
 0x21e   :  { %v307_v57 = vpack.c.bf16 %v306_v56, %v306_v56 }
 0x220   :  { %925 = vmatmul.mubr.bf16.vlgmr.msra.gmra.mrb[4].mxu1 %v307_v57 }
 0x221   :  { %964 = vmatprep.mubr.msk.bf16.mxu1 %vm1108_vm2, %v1107_v1  ;;  %949 = vmatpush3.bf16.msra.mxu1 %v1028_v0 }
 0x222   :  { %950 = vmatprep.subr.bf16.mxu1 %v1107_v1 }
 0x225   :  { %951 = vmatpush3.bf16.msra.mxu1 %v1029_v2 }
 0x226   :  { %952 = vmatprep.subr.bf16.mxu1 %v1107_v1 }
 0x229   :  { %953 = vmatpush3.bf16.msra.mxu1 %v1030_v15 }
 0x22a   :  { %954 = vmatprep.subr.bf16.mxu1 %v1107_v1 }
 0x22d   :  { %955 = vmatpush3.bf16.msra.mxu1 %v1031_v16 }
 0x22e   :  { %956 = vmatprep.subr.bf16.mxu1 %v1107_v1 }
 0x231   :  { %957 = vmatpush3.bf16.msra.mxu1 %v1032_v17 }
 0x232   :  { %958 = vmatprep.subr.bf16.mxu1 %v1107_v1 }
 0x235   :  { %959 = vmatpush3.bf16.msra.mxu1 %v1033_v18 }
 0x236   :  { %960 = vmatprep.subr.bf16.mxu1 %v1107_v1 }
 0x239   :  { %961 = vmatpush3.bf16.msra.mxu1 %v1034_v19 }
 0x23a   :  { %962 = vmatprep.subr.bf16.mxu1 %v1107_v1 }
 0x23d   :  { %963 = vmatpush3.bf16.msra.mxu1 %v1035_v20 }
 0x2f3   :  { %v415_v4 = vpop.f32.mrb[4].mxu1 }
 0x2f4   :  { %v416_v5 = vadd.f32 %v805_v3, %v415_v4  ;;  %v926_v6 = vpop.f32.mrb[5].mxu1 }
 0x2f5   :  { %v418_v7 = vpop.f32.mrb[6].mxu1 }
 0x2f6   :  { %v421_v8 = vmul.f32 0.5, %v416_v5  ;;  %v927_v9 = vpop.f32.mrb[7].mxu1 }
 0x2f8   :  { %1048 = vtanh.f32 %v421_v8 }
 0x302   :  { %v1049_v10 = vpop.eup %1048 }
 0x303   :  { %v423_v11 = vmul.f32 0.5, %v1049_v10 }
 0x305   :  { %v424_v12 = vadd.f32 0.5, %v423_v11 }
 0x307   :  { %v425_v13 = vmul.f32 %v424_v12, %v416_v5 }
 0x309   :  { %v426_v14 = vpack.c.bf16 %v425_v13, %v425_v13 }
 0x30b   :  { %945 = vmatmul.mubr.bf16.vlgmr.msra.gmra.mrb[4].mxu0 %v426_v14 }
 0x30c   :  { %984 = vmatprep.mubr.msk.bf16.mxu0 %vm1108_vm2, %v1107_v1  ;;  %969 = vmatpush3.bf16.msra.mxu0 %v1036_v21 }
 0x30d   :  { %970 = vmatprep.subr.bf16.mxu0 %v1107_v1 }
 0x310   :  { %971 = vmatpush3.bf16.msra.mxu0 %v1037_v22 }
 0x311   :  { %972 = vmatprep.subr.bf16.mxu0 %v1107_v1 }
 0x314   :  { %973 = vmatpush3.bf16.msra.mxu0 %v1038_v35 }
 0x315   :  { %974 = vmatprep.subr.bf16.mxu0 %v1107_v1 }
 0x318   :  { %975 = vmatpush3.bf16.msra.mxu0 %v1039_v36 }
 0x319   :  { %976 = vmatprep.subr.bf16.mxu0 %v1107_v1 }
 0x31c   :  { %977 = vmatpush3.bf16.msra.mxu0 %v1040_v37 }
 0x31d   :  { %978 = vmatprep.subr.bf16.mxu0 %v1107_v1 }
 0x320   :  { %979 = vmatpush3.bf16.msra.mxu0 %v1041_v38 }
 0x321   :  { %980 = vmatprep.subr.bf16.mxu0 %v1107_v1 }
 0x324   :  { %981 = vmatpush3.bf16.msra.mxu0 %v1042_v39 }
 0x325   :  { %982 = vmatprep.subr.bf16.mxu0 %v1107_v1 }
 0x328   :  { %983 = vmatpush3.bf16.msra.mxu0 %v1043_v40 }
 0x3de   :  { %v534_v24 = vpop.f32.mrb[4].mxu0 }
 0x3df   :  { %v535_v25 = vadd.f32 %v815_v23, %v534_v24  ;;  %v946_v26 = vpop.f32.mrb[5].mxu0 }
 0x3e0   :  { %v537_v27 = vpop.f32.mrb[6].mxu0 }
 0x3e1   :  { %v540_v28 = vmul.f32 0.5, %v535_v25  ;;  %v947_v29 = vpop.f32.mrb[7].mxu0 }
 0x3e3   :  { %1050 = vtanh.f32 %v540_v28 }
 0x3ed   :  { %v1051_v30 = vpop.eup %1050 }
 0x3ee   :  { %v542_v31 = vmul.f32 0.5, %v1051_v30 }
 0x3f0   :  { %v543_v32 = vadd.f32 0.5, %v542_v31 }
 0x3f2   :  { %v544_v33 = vmul.f32 %v543_v32, %v535_v25 }
 0x3f4   :  { %v545_v34 = vpack.c.bf16 %v544_v33, %v544_v33 }
 0x3f6   :  { %965 = vmatmul.mubr.bf16.vlgmr.msra.gmra.mrb[8].mxu1 %v545_v34 }
 0x4c9   :  { %v653_v42 = vpop.f32.mrb[8].mxu1 }
 0x4ca   :  { %v654_v43 = vadd.f32 %v825_v41, %v653_v42  ;;  %v966_v44 = vpop.f32.mrb[9].mxu1 }
 0x4cb   :  { %v656_v45 = vpop.f32.mrb[10].mxu1 }
 0x4cc   :  { %v659_v46 = vmul.f32 0.5, %v654_v43  ;;  %v967_v47 = vpop.f32.mrb[11].mxu1 }
 0x4ce   :  { %1052 = vtanh.f32 %v659_v46 }
 0x4d8   :  { %v1053_v48 = vpop.eup %1052 }
 0x4d9   :  { %v661_v49 = vmul.f32 0.5, %v1053_v48 }
 0x4db   :  { %v662_v50 = vadd.f32 0.5, %v661_v49 }
 0x4dd   :  { %v663_v1 = vmul.f32 %v662_v50, %v654_v43 }
 0x4df   :  { %v664_v51 = vpack.c.bf16 %v663_v1, %v663_v1 }
 0x4e1   :  { %985 = vmatmul.mubr.bf16.vlgmr.msra.gmra.mrb[8].mxu0 %v664_v51 }
 0x5b4   :  { %v770_v53 = vpop.f32.mrb[8].mxu0 }
 0x5b5   :  { %v771_v54 = vadd.f32 %v834_v52, %v770_v53  ;;  %v986_v55 = vpop.f32.mrb[9].mxu0 }
 0x5b6   :  { %v773_v56 = vpop.f32.mrb[10].mxu0 }
 0x5b7   :  { %777 = vst.msk [vmem:[%s1281_s7] sm:$0xff] %vm776_vm3, %v771_v54  ;;  %v987_v57 = vpop.f32.mrb[11].mxu0 }
 0x5b8   :  { %782 = vsyncpa [#allocation3], 1 }
 0x5b9   :  { %783 = vsyncpa [#allocation5], 1 }

</bundles_post_ra>
